<compile_context>
chip_gen: v7x
topology: tpu7x:2x2x1
jax: 0.10.0
libtpu: 0.0.40
codegen_flags: <defaults>
</compile_context>

<pallas_src>
import jax
import jax.numpy as jnp
import numpy as np
from jax.experimental import pallas as pl
from jax.experimental.pallas import tpu as pltpu


def _round_up(x, m):
    return ((x + m - 1) // m) * m


# ----------------------------------------------------------------------------
# Pallas kernel: pair-sum + 3-layer MLP (Linear/SiLU/Linear/SiLU/Linear)
# ----------------------------------------------------------------------------
def _make_kernel(C, num_target):
    def kernel(g_ref, w1_ref, b1_ref, w2_ref, b2_ref, w3_ref, b3_ref, o_ref):
        # scatter_add over the pair axis: out[g] = x[cleaves[2g]] + x[cleaves[2g+1]]
        # g_ref block is (2, TG, C) bf16; pair-sum in f32 on the VPU.
        h = g_ref[0].astype(jnp.float32) + g_ref[1].astype(jnp.float32)   # (TG, C)

        # Linear 1 + SiLU  (bf16 MXU matmul, f32 accumulation; sigmoid -> EUP)
        h = jnp.dot(h.astype(jnp.bfloat16), w1_ref[...],
                    preferred_element_type=jnp.float32) + b1_ref[...]
        h = h * jax.nn.sigmoid(h)

        # Linear 2 + SiLU
        h = jnp.dot(h.astype(jnp.bfloat16), w2_ref[...],
                    preferred_element_type=jnp.float32) + b2_ref[...]
        h = h * jax.nn.sigmoid(h)

        # Linear 3 (C -> num_target)
        if num_target == 1:
            # N=1 matmul would use 1 of 128/256 MXU output columns and still
            # pay the full result-FIFO drain: do VPU multiply + lane reduce.
            o = jnp.sum(h * w3_ref[...], axis=-1, keepdims=True) + b3_ref[...]
        else:
            o = jnp.dot(h, w3_ref[...],
                        preferred_element_type=jnp.float32) + b3_ref[...]
        o_ref[...] = o.astype(o_ref.dtype)

    return kernel


# ----------------------------------------------------------------------------
# Wrapper
# ----------------------------------------------------------------------------
def pairwise_forward(x, is_cleave, num_graphs, params, *, max_tile=2048):
    """JAX wrapper reproducing PairWise.forward.

    x:          (N, C) node features (float32)
    is_cleave:  (N,)   boolean mask with exactly 2*num_graphs True entries
    num_graphs: static python int
    params:     dict with w1,b1,w2,b2,w3,b3 (weights stored as (in, out), f32)
    returns:    (num_graphs * num_target,) flattened float32 output
    """
    N, C = x.shape
    num_target = params["w3"].shape[-1]

    # ---- row-tile selection -------------------------------------------------
    # Small problems run as a single grid step (pallas_call/per-step overhead
    # dominates there); large ones use big pipelined tiles. Tiles are multiples
    # of 16 (bf16 sublane packing). At tg=2048, C=256 the double-buffered input
    # tiles are ~4 MiB + ~0.3 MiB resident weights -> far below the 32 MiB
    # scoped VMEM default on v6e/v7x, so no vmem_limit override is needed.
    if num_graphs <= max_tile:
        tg = max(_round_up(num_graphs, 16), 16)
        num_tiles = 1
    else:
        tg = _round_up(max_tile, 16)
        num_tiles = pl.cdiv(num_graphs, tg)
    g_pad = num_tiles * tg

    # ---- glue (plain JAX): argwhere-style gather with a static size ---------
    # nonzero pads with index 0 beyond the 2*num_graphs real entries; the
    # corresponding padded rows produce garbage that is sliced off at the end,
    # so remainder tiles need no in-kernel masking.
    cleaves = jnp.nonzero(is_cleave, size=2 * g_pad, fill_value=0)[0]     # (2*Gp,)
    # Reorder [a0,b0,a1,b1,...] -> [a..., b...] so the kernel sees the two pair
    # members on a clean leading batch axis: gathered[p, g, :].
    idx = cleaves.reshape(g_pad, 2).T.reshape(-1)
    gathered = x[idx].astype(jnp.bfloat16).reshape(2, g_pad, C)

    # Weights feeding the MXU go in bf16 (halves resident/DMA bytes); biases,
    # the final projection and all elementwise math stay f32.
    w1 = params["w1"].astype(jnp.bfloat16)
    w2 = params["w2"].astype(jnp.bfloat16)
    b1 = params["b1"]
    b2 = params["b2"]
    if num_target == 1:
        w3 = params["w3"].reshape(1, C)               # row vector for VPU reduce
        b3 = params["b3"].reshape(1, 1)
        w3_spec = pl.BlockSpec((1, C), lambda i: (0, 0))
        b3_spec = pl.BlockSpec((1, 1), lambda i: (0, 0))
    else:
        w3 = params["w3"]                             # (C, T)
        b3 = params["b3"].reshape(1, num_target)
        w3_spec = pl.BlockSpec((C, num_target), lambda i: (0, 0))
        b3_spec = pl.BlockSpec((1, num_target), lambda i: (0, 0))

    out = pl.pallas_call(
        _make_kernel(C, num_target),
        out_shape=jax.ShapeDtypeStruct((g_pad, num_target), jnp.float32),
        grid_spec=pltpu.PrefetchScalarGridSpec(
            num_scalar_prefetch=0,
            grid=(num_tiles,),
            in_specs=[
                # gathered pair rows: tiled along the graph axis (pipelined)
                pl.BlockSpec((2, tg, C), lambda i: (0, i, 0)),
                # weights/biases: constant index_map -> stay VMEM-resident
                pl.BlockSpec((C, C), lambda i: (0, 0)),
                pl.BlockSpec((1, C), lambda i: (0, 0)),
                pl.BlockSpec((C, C), lambda i: (0, 0)),
                pl.BlockSpec((1, C), lambda i: (0, 0)),
                w3_spec,
                b3_spec,
            ],
            out_specs=pl.BlockSpec((tg, num_target), lambda i: (i, 0)),
        ),
        compiler_params=pltpu.CompilerParams(
            # Row tiles are independent -> shard across v7x's two TensorCores.
            dimension_semantics=("parallel",),
        ),
    )(gathered, w1, b1, w2, b2, w3, b3)

    return out[:num_graphs].reshape(-1)               # .view(-1)


# ----------------------------------------------------------------------------
# Deterministic parameter init (mirrors Glorot_Ortho_ + zero bias)
# ----------------------------------------------------------------------------
def _glorot_ortho(key, out_features, in_features):
    a = jax.random.normal(key, (out_features, in_features), jnp.float32)
    if out_features >= in_features:
        q, _ = jnp.linalg.qr(a)                 # (out, in), orthonormal cols
    else:
        q, _ = jnp.linalg.qr(a.T)               # (in, out)
        q = q.T
    scale = jnp.sqrt(2.0 / (in_features + out_features))
    w = q * scale / jnp.maximum(jnp.std(q), 1e-6) * jnp.sqrt(1.0 / in_features)
    # store transposed (in, out) so the kernel computes h @ W + b
    return w.T.astype(jnp.float32)


def init_params(key, in_channels, num_target):
    k1, k2, k3 = jax.random.split(key, 3)
    return {
        "w1": _glorot_ortho(k1, in_channels, in_channels),        # (C, C)
        "b1": jnp.zeros((1, in_channels), jnp.float32),
        "w2": _glorot_ortho(k2, in_channels, in_channels),        # (C, C)
        "b2": jnp.zeros((1, in_channels), jnp.float32),
        "w3": _glorot_ortho(k3, num_target, in_channels),         # (C, T)
        "b3": jnp.zeros((1, num_target), jnp.float32),
    }


# ----------------------------------------------------------------------------
# Pure-JAX reference mirroring the kernel's precision choices
# (bf16 gathered rows / w1 / w2, f32 accumulation + f32 elementwise math).
# ----------------------------------------------------------------------------
def pairwise_reference(x, is_cleave, num_graphs, params):
    C = x.shape[-1]
    cleaves = jnp.nonzero(is_cleave, size=2 * num_graphs)[0]
    pairs = x[cleaves].astype(jnp.bfloat16).reshape(num_graphs, 2, C)
    h = pairs[:, 0, :].astype(jnp.float32) + pairs[:, 1, :].astype(jnp.float32)
    h = jnp.dot(h.astype(jnp.bfloat16), params["w1"].astype(jnp.bfloat16),
                preferred_element_type=jnp.float32) + params["b1"]
    h = h * jax.nn.sigmoid(h)
    h = jnp.dot(h.astype(jnp.bfloat16), params["w2"].astype(jnp.bfloat16),
                preferred_element_type=jnp.float32) + params["b2"]
    h = h * jax.nn.sigmoid(h)
    h = jnp.dot(h, params["w3"],
                precision=jax.lax.Precision.HIGHEST) + params["b3"]
    return h.reshape(-1)


if __name__ == "__main__":
    # Small shapes consistent with the module's forward.
    num_nodes = 64
    in_channels = 32
    num_graphs = 24
    num_target = 1

    key = jax.random.PRNGKey(0)
    kx, kc, kp = jax.random.split(key, 3)

    x = jax.random.normal(kx, (num_nodes, in_channels), jnp.float32)

    # Exactly 2 * num_graphs True entries (two cleave nodes per graph).
    cleave_idx = jax.random.permutation(kc, num_nodes)[: 2 * num_graphs]
    is_cleave = jnp.zeros((num_nodes,), jnp.bool_).at[cleave_idx].set(True)

    params = init_params(kp, in_channels, num_target)

    fwd = jax.jit(pairwise_forward, static_argnames=("num_graphs", "max_tile"))

    # 1) single-tile path (whole problem in one padded grid step).
    out_single = jax.block_until_ready(
        fwd(x, is_cleave, num_graphs=num_graphs, params=params))
    # 2) multi-tile pipelined/parallel path (force tiny tiles -> grid of 2).
    out_tiled = jax.block_until_ready(
        fwd(x, is_cleave, num_graphs=num_graphs, params=params, max_tile=16))

    ref = pairwise_reference(x, is_cleave, num_graphs, params)
    np.testing.assert_allclose(np.asarray(out_single), np.asarray(ref),
                               rtol=1e-3, atol=1e-3)
    np.testing.assert_allclose(np.asarray(out_tiled), np.asarray(ref),
                               rtol=1e-3, atol=1e-3)

    print("KERNEL_OK")
</pallas_src>

<mosaic_0001>
module attributes {stable_mosaic.version = 11 : i64} {
  func.func private @main(%arg0: i32) attributes {dimension_semantics = [#tpu.dimension_semantics<core_parallel>], iteration_bounds = array<i64: 2>, tpu.core_type = #tpu.core_type<sc_scalar_subcore>, window_params = []} {
    return
  }
}

module attributes {stable_mosaic.version = 11 : i64} {
  func.func private @main(%arg0: i32) attributes {dimension_semantics = [#tpu.dimension_semantics<core_parallel>], iteration_bounds = array<i64: 2>, tpu.core_type = #tpu.core_type<sc_scalar_subcore>, window_params = []} {
    return
  }
}

module attributes {stable_mosaic.version = 11 : i64} {
  func.func @kernel(%arg0: i32, %arg1: memref<2x32x32xbf16, #tpu.memory_space<vmem>>, %arg2: memref<32x32xbf16, #tpu.memory_space<vmem>>, %arg3: memref<1x32xf32, #tpu.memory_space<vmem>>, %arg4: memref<32x32xbf16, #tpu.memory_space<vmem>>, %arg5: memref<1x32xf32, #tpu.memory_space<vmem>>, %arg6: memref<1x32xf32, #tpu.memory_space<vmem>>, %arg7: memref<1x1xf32, #tpu.memory_space<vmem>>, %arg8: memref<32x1xf32, #tpu.memory_space<vmem>>) attributes {dimension_semantics = [#tpu.dimension_semantics<parallel>], iteration_bounds = array<i64: 1>, scalar_prefetch = 0 : i64, scratch_operands = 0 : i64, tpu.core_type = #tpu.core_type<tc>, window_params = [{transform_indices = @transform_0, window_bounds = array<i64: 2, 32, 32>}, {pipeline_mode = #tpu.pipeline_mode<synchronous>, transform_indices = @transform_1, window_bounds = array<i64: 32, 32>}, {pipeline_mode = #tpu.pipeline_mode<synchronous>, transform_indices = @transform_2, window_bounds = array<i64: 1, 32>}, {pipeline_mode = #tpu.pipeline_mode<synchronous>, transform_indices = @transform_3, window_bounds = array<i64: 32, 32>}, {pipeline_mode = #tpu.pipeline_mode<synchronous>, transform_indices = @transform_4, window_bounds = array<i64: 1, 32>}, {pipeline_mode = #tpu.pipeline_mode<synchronous>, transform_indices = @transform_5, window_bounds = array<i64: 1, 32>}, {pipeline_mode = #tpu.pipeline_mode<synchronous>, transform_indices = @transform_6, window_bounds = array<i64: 1, 1>}, {transform_indices = @transform_7, window_bounds = array<i64: 32, 1>}]} {
    %c0 = arith.constant 0 : index
    %c0_0 = arith.constant 0 : index
    %c0_1 = arith.constant 0 : index
    %0 = vector.load %arg1[%c0, %c0_0, %c0_1] : memref<2x32x32xbf16, #tpu.memory_space<vmem>>, vector<1x32x32xbf16>
    %1 = vector.shape_cast %0 : vector<1x32x32xbf16> to vector<32x32xbf16>
    %2 = arith.extf %1 : vector<32x32xbf16> to vector<32x32xf32>
    %c1 = arith.constant 1 : index
    %c0_2 = arith.constant 0 : index
    %c0_3 = arith.constant 0 : index
    %3 = vector.load %arg1[%c1, %c0_2, %c0_3] : memref<2x32x32xbf16, #tpu.memory_space<vmem>>, vector<1x32x32xbf16>
    %4 = vector.shape_cast %3 : vector<1x32x32xbf16> to vector<32x32xbf16>
    %5 = arith.extf %4 : vector<32x32xbf16> to vector<32x32xf32>
    %6 = arith.addf %2, %5 : vector<32x32xf32>
    %7 = arith.truncf %6 : vector<32x32xf32> to vector<32x32xbf16>
    %c0_4 = arith.constant 0 : index
    %c0_5 = arith.constant 0 : index
    %8 = vector.load %arg2[%c0_4, %c0_5] : memref<32x32xbf16, #tpu.memory_space<vmem>>, vector<32x32xbf16>
    %cst = arith.constant dense<0.000000e+00> : vector<32x32xf32>
    %9 = tpu.matmul %7, %8, %cst {dimension_numbers = #tpu.dot_dimension_numbers<[1], [0], [0], [1], [0, 0, 1, 1], [], []>} : vector<32x32xbf16>, vector<32x32xbf16>, vector<32x32xf32> -> vector<32x32xf32>
    %c0_6 = arith.constant 0 : index
    %c0_7 = arith.constant 0 : index
    %10 = vector.load %arg3[%c0_6, %c0_7] : memref<1x32xf32, #tpu.memory_space<vmem>>, vector<1x32xf32>
    %11 = vector.broadcast %10 : vector<1x32xf32> to vector<32x32xf32>
    %12 = arith.addf %9, %11 : vector<32x32xf32>
    %13 = arith.negf %12 : vector<32x32xf32>
    %14 = math.exp %13 : vector<32x32xf32>
    %cst_8 = arith.constant 1.000000e+00 : f32
    %15 = vector.broadcast %cst_8 : f32 to vector<32x32xf32>
    %16 = arith.addf %15, %14 : vector<32x32xf32>
    %17 = arith.divf %15, %16 : vector<32x32xf32>
    %18 = arith.mulf %12, %17 : vector<32x32xf32>
    %19 = arith.truncf %18 : vector<32x32xf32> to vector<32x32xbf16>
    %c0_9 = arith.constant 0 : index
    %c0_10 = arith.constant 0 : index
    %20 = vector.load %arg4[%c0_9, %c0_10] : memref<32x32xbf16, #tpu.memory_space<vmem>>, vector<32x32xbf16>
    %cst_11 = arith.constant dense<0.000000e+00> : vector<32x32xf32>
    %21 = tpu.matmul %19, %20, %cst_11 {dimension_numbers = #tpu.dot_dimension_numbers<[1], [0], [0], [1], [0, 0, 1, 1], [], []>} : vector<32x32xbf16>, vector<32x32xbf16>, vector<32x32xf32> -> vector<32x32xf32>
    %c0_12 = arith.constant 0 : index
    %c0_13 = arith.constant 0 : index
    %22 = vector.load %arg5[%c0_12, %c0_13] : memref<1x32xf32, #tpu.memory_space<vmem>>, vector<1x32xf32>
    %23 = vector.broadcast %22 : vector<1x32xf32> to vector<32x32xf32>
    %24 = arith.addf %21, %23 : vector<32x32xf32>
    %25 = arith.negf %24 : vector<32x32xf32>
    %26 = math.exp %25 : vector<32x32xf32>
    %cst_14 = arith.constant 1.000000e+00 : f32
    %27 = vector.broadcast %cst_14 : f32 to vector<32x32xf32>
    %28 = arith.addf %27, %26 : vector<32x32xf32>
    %29 = arith.divf %27, %28 : vector<32x32xf32>
    %30 = arith.mulf %24, %29 : vector<32x32xf32>
    %c0_15 = arith.constant 0 : index
    %c0_16 = arith.constant 0 : index
    %31 = vector.load %arg6[%c0_15, %c0_16] : memref<1x32xf32, #tpu.memory_space<vmem>>, vector<1x32xf32>
    %32 = vector.broadcast %31 : vector<1x32xf32> to vector<32x32xf32>
    %33 = arith.mulf %30, %32 : vector<32x32xf32>
    %cst_17 = arith.constant dense<0.000000e+00> : vector<32xf32>
    %34 = vector.multi_reduction <add>, %33, %cst_17 [1] : vector<32x32xf32> to vector<32xf32>
    %35 = vector.shape_cast %34 : vector<32xf32> to vector<32x1xf32>
    %c0_18 = arith.constant 0 : index
    %c0_19 = arith.constant 0 : index
    %36 = vector.load %arg7[%c0_18, %c0_19] : memref<1x1xf32, #tpu.memory_space<vmem>>, vector<1x1xf32>
    %37 = vector.broadcast %36 : vector<1x1xf32> to vector<32x1xf32>
    %38 = arith.addf %35, %37 : vector<32x1xf32>
    %c0_20 = arith.constant 0 : index
    %c0_21 = arith.constant 0 : index
    %39 = vector.load %arg8[%c0_20, %c0_21] : memref<32x1xf32, #tpu.memory_space<vmem>>, vector<32x1xf32>
    tpu.vector_store %arg8[%c0_20, %c0_21], %38 {strides = array<i32>} : memref<32x1xf32, #tpu.memory_space<vmem>>, vector<32x1xf32>,
    return
  }
  func.func @transform_0(%arg0: i32) -> (i32, i32, i32) {
    %c0_i32 = arith.constant 0 : i32
    %c0_i32_0 = arith.constant 0 : i32
    %c0_i32_1 = arith.constant 0 : i32
    return %c0_i32, %arg0, %c0_i32_0 : i32, i32, i32
  }
  func.func @transform_1(%arg0: i32) -> (i32, i32) {
    %c0_i32 = arith.constant 0 : i32
    %c0_i32_0 = arith.constant 0 : i32
    %c0_i32_1 = arith.constant 0 : i32
    return %c0_i32, %c0_i32_0 : i32, i32
  }
  func.func @transform_2(%arg0: i32) -> (i32, i32) {
    %c0_i32 = arith.constant 0 : i32
    %c0_i32_0 = arith.constant 0 : i32
    %c0_i32_1 = arith.constant 0 : i32
    return %c0_i32, %c0_i32_0 : i32, i32
  }
  func.func @transform_3(%arg0: i32) -> (i32, i32) {
    %c0_i32 = arith.constant 0 : i32
    %c0_i32_0 = arith.constant 0 : i32
    %c0_i32_1 = arith.constant 0 : i32
    return %c0_i32, %c0_i32_0 : i32, i32
  }
  func.func @transform_4(%arg0: i32) -> (i32, i32) {
    %c0_i32 = arith.constant 0 : i32
    %c0_i32_0 = arith.constant 0 : i32
    %c0_i32_1 = arith.constant 0 : i32
    return %c0_i32, %c0_i32_0 : i32, i32
  }
  func.func @transform_5(%arg0: i32) -> (i32, i32) {
    %c0_i32 = arith.constant 0 : i32
    %c0_i32_0 = arith.constant 0 : i32
    %c0_i32_1 = arith.constant 0 : i32
    return %c0_i32, %c0_i32_0 : i32, i32
  }
  func.func @transform_6(%arg0: i32) -> (i32, i32) {
    %c0_i32 = arith.constant 0 : i32
    %c0_i32_0 = arith.constant 0 : i32
    %c0_i32_1 = arith.constant 0 : i32
    return %c0_i32, %c0_i32_0 : i32, i32
  }
  func.func @transform_7(%arg0: i32) -> (i32, i32) {
    %c0_i32 = arith.constant 0 : i32
    %c0_i32_0 = arith.constant 0 : i32
    return %arg0, %c0_i32 : i32, i32
  }
}

</mosaic_0001>

<bundles_post_ra>
// kernel: pairwise_forward.1
= control target key start
LH: loop header
LB: loop body
LE: loop exit
PB: predicated region body
PF: predicated region fallthrough
CT: control target
= control target key end

     0   :  { %vm75_vm0 = vcmask 261120   ;;  %vm301_vm1 = vcmask 7168   ;;  %s509_s1 = inlined_call_operand.vmem [shape: bf16[32,32], index: 1, kind: input, shape index: {}]   ;;  %s510_s0 = inlined_call_operand.vmem [shape: bf16[2,32,32], index: 0, kind: input, shape index: {}]   ;;  %s511_s3 = inlined_call_operand.vmem [shape: bf16[32,32], index: 3, kind: input, shape index: {}]   ;;  %s512_s2 = inlined_call_operand.vmem [shape: f32[1,32], index: 2, kind: input, shape index: {}]   ;;  %s513_s6 = inlined_call_operand.<no memory space> [shape: f32[1,1], index: 6, kind: input, shape index: {}]   ;;  %s514_s4 = inlined_call_operand.vmem [shape: f32[1,32], index: 4, kind: input, shape index: {}]   ;;  %s515_s5 = inlined_call_operand.vmem [shape: f32[1,32], index: 5, kind: input, shape index: {}]   ;;  %s516_s7 = inlined_call_operand.vmem [shape: f32[32,1], index: 7, kind: output, shape index: {}]  }
   0x1   :  { %v377_v0 = vld [vmem:[%s509_s1] sm:$0xff]   ;;  %v378_v1 = vld [vmem:[%s509_s1 + $0x8] sm:$0xff]   ;;  %v351_v3 = vld [vmem:[%s510_s0 + $0x10] sm:$0xff]   ;;  %v12_v53 = vstv %s513_s6 }
   0x2   :  { %361 = vmatprep.subr.bf16.mxu0 %v377_v0  ;;  %v335_v2 = vld [vmem:[%s510_s0] sm:$0xff]   ;;  %v350_v4 = vld [vmem:[%s510_s0 + $0x8] sm:$0xff]   ;;  %v344_v7 = vunpack.c.l.bf16 %v351_v3  ;;  %v345_v8 = vunpack.c.h.bf16 %v351_v3  ;;  %v352_v9 = vld [vmem:[%s510_s0 + $0x18] sm:$0xff]   ;;  %13 = vst [vmem:[#allocation2] sm:$0x1] %v12_v53 }
   0x3   :  { %362 = vmatpush3.bf16.msra.mxu0 %v377_v0  ;;  %v336_v5 = vunpack.c.l.bf16 %v335_v2  ;;  %v337_v6 = vunpack.c.h.bf16 %v335_v2  ;;  %v340_v10 = vunpack.c.l.bf16 %v350_v4  ;;  %v341_v11 = vunpack.c.h.bf16 %v350_v4  ;;  %v379_v20 = vld [vmem:[%s511_s3] sm:$0xff]   ;;  %v380_v21 = vld [vmem:[%s511_s3 + $0x8] sm:$0xff]  }
   0x4   :  { %363 = vmatprep.subr.bf16.mxu0 %v378_v1  ;;  %v348_v12 = vunpack.c.l.bf16 %v352_v9  ;;  %v349_v13 = vunpack.c.h.bf16 %v352_v9  ;;  %369 = vmatprep.subr.bf16.mxu1 %v379_v20  ;;  %v314_v22 = vld [vmem:[%s512_s2] ss:$0 sm:$0xff] }
   0x5   :  { %v46_v14 = vadd.f32 %v344_v7, %v336_v5  ;;  %v47_v15 = vadd.f32 %v345_v8, %v337_v6  ;;  %370 = vmatpush3.bf16.msra.mxu1 %v379_v20  ;;  %v323_v54 = vld [vmem:[%s514_s4] ss:$0 sm:$0xff] }
   0x6   :  { %v48_v16 = vadd.f32 %v348_v12, %v340_v10  ;;  %v49_v17 = vadd.f32 %v349_v13, %v341_v11  ;;  %371 = vmatprep.subr.bf16.mxu1 %v380_v21  ;;  %v332_v12 = vld [vmem:[%s515_s5] ss:$0 sm:$0xff] }
   0x7   :  { %364 = vmatpush3.bf16.msra.mxu0 %v378_v1  ;;  %v50_v18 = vpack.c.bf16 %v47_v15, %v46_v14 }
   0x8   :  { %v51_v19 = vpack.c.bf16 %v49_v17, %v48_v16 }
   0x9   :  { %365 = vmatprep.mubr.msk.bf16.mxu0 %vm75_vm0, %v50_v18  ;;  %372 = vmatpush3.bf16.msra.mxu1 %v380_v21 }
   0xa   :  { %366 = vmatmul.mubr.msk.bf16.vlgmr.msra.gmra.mrb[0].mxu0 %vm75_vm0, %v51_v19 }
  0xdd   :  { %v367_v23 = vpop.f32.mrb[0].mxu0 }
  0xde   :  { %v125_v24 = vadd.f32 %v367_v23, %v314_v22  ;;  %v116_v25 = vpop.f32.mrb[1].mxu0 }
  0xdf   :  { %v117_v26 = vadd.f32 %v314_v22, %v116_v25  ;;  %v368_v27 = vpop.f32.mrb[2].mxu0 }
  0xe0   :  { %v321_v28 = vmul.f32 -1.442695, %v125_v24  ;;  %v128_v29 = vadd.f32 %v368_v27, %v314_v22  ;;  %v119_v30 = vpop.f32.mrb[3].mxu0 }
  0xe1   :  { %v319_v31 = vmul.f32 -1.442695, %v117_v26  ;;  %v120_v32 = vadd.f32 %v314_v22, %v119_v30 }
  0xe2   :  { %381 = vpow2.f32 %v321_v28  ;;  %v322_v33 = vmul.f32 -1.442695, %v128_v29  ;;  %v333_v28 = vld [vmem:[#allocation2] ss:$0 sm:$0xff] }
  0xe3   :  { %383 = vpow2.f32 %v319_v31  ;;  %v320_v34 = vmul.f32 -1.442695, %v120_v32 }
  0xe4   :  { %385 = vpow2.f32 %v322_v33 }
  0xe5   :  { %387 = vpow2.f32 %v320_v34 }
  0xec   :  { %v382_v35 = vpop.eup %381 }
  0xed   :  { %v384_v36 = vpop.eup %383  ;;  %v145_v37 = vadd.f32 1.0, %v382_v35 }
  0xee   :  { %v386_v38 = vpop.eup %385  ;;  %v143_v39 = vadd.f32 1.0, %v384_v36 }
  0xef   :  { %v388_v40 = vpop.eup %387  ;;  %389 = vrcp.f32 %v145_v37  ;;  %v146_v41 = vadd.f32 1.0, %v386_v38 }
  0xf0   :  { %391 = vrcp.f32 %v143_v39  ;;  %v144_v42 = vadd.f32 1.0, %v388_v40 }
  0xf1   :  { %393 = vrcp.f32 %v146_v41 }
  0xf2   :  { %395 = vrcp.f32 %v144_v42 }
  0xf9   :  { %v390_v43 = vpop.eup %389 }
  0xfa   :  { %v392_v44 = vpop.eup %391  ;;  %v157_v47 = vmul.f32 %v390_v43, %v125_v24 }
  0xfb   :  { %v394_v45 = vpop.eup %393  ;;  %v155_v49 = vmul.f32 %v392_v44, %v117_v26 }
  0xfc   :  { %v396_v46 = vpop.eup %395  ;;  %v158_v48 = vmul.f32 %v394_v45, %v128_v29 }
  0xfd   :  { %v156_v50 = vmul.f32 %v396_v46, %v120_v32 }
  0xfe   :  { %v160_v51 = vpack.c.bf16 %v158_v48, %v157_v47 }
  0xff   :  { %v159_v52 = vpack.c.bf16 %v156_v50, %v155_v49 }
 0x101   :  { %373 = vmatprep.mubr.msk.bf16.mxu1 %vm75_vm0, %v159_v52 }
 0x102   :  { %374 = vmatmul.mubr.msk.bf16.vlgmr.msra.gmra.mrb[0].mxu1 %vm75_vm0, %v160_v51 }
 0x1d5   :  { %v375_v55 = vpop.f32.mrb[0].mxu1 }
 0x1d6   :  { %v233_v56 = vadd.f32 %v375_v55, %v323_v54  ;;  %v224_v57 = vpop.f32.mrb[1].mxu1 }
 0x1d7   :  { %v225_v58 = vadd.f32 %v323_v54, %v224_v57  ;;  %v376_v59 = vpop.f32.mrb[2].mxu1 }
 0x1d8   :  { %v330_v60 = vmul.f32 -1.442695, %v233_v56  ;;  %v236_v61 = vadd.f32 %v376_v59, %v323_v54  ;;  %v227_v62 = vpop.f32.mrb[3].mxu1 }
 0x1d9   :  { %v328_v63 = vmul.f32 -1.442695, %v225_v58  ;;  %v228_v0 = vadd.f32 %v323_v54, %v227_v62 }
 0x1da   :  { %397 = vpow2.f32 %v330_v60  ;;  %v331_v1 = vmul.f32 -1.442695, %v236_v61 }
 0x1db   :  { %399 = vpow2.f32 %v328_v63  ;;  %v329_v2 = vmul.f32 -1.442695, %v228_v0 }
 0x1dc   :  { %401 = vpow2.f32 %v331_v1 }
 0x1dd   :  { %403 = vpow2.f32 %v329_v2 }
 0x1e4   :  { %v398_v3 = vpop.eup %397 }
 0x1e5   :  { %v400_v4 = vpop.eup %399  ;;  %v253_v5 = vadd.f32 1.0, %v398_v3 }
 0x1e6   :  { %v402_v6 = vpop.eup %401  ;;  %v251_v7 = vadd.f32 1.0, %v400_v4 }
 0x1e7   :  { %v404_v8 = vpop.eup %403  ;;  %405 = vrcp.f32 %v253_v5  ;;  %v254_v9 = vadd.f32 1.0, %v402_v6 }
 0x1e8   :  { %407 = vrcp.f32 %v251_v7  ;;  %v252_v10 = vadd.f32 1.0, %v404_v8 }
 0x1e9   :  { %409 = vrcp.f32 %v254_v9 }
 0x1ea   :  { %411 = vrcp.f32 %v252_v10 }
 0x1f1   :  { %v406_v11 = vpop.eup %405 }
 0x1f2   :  { %v408_v13 = vpop.eup %407  ;;  %v265_v14 = vmul.f32 %v406_v11, %v233_v56 }
 0x1f3   :  { %v410_v15 = vpop.eup %409  ;;  %v263_v16 = vmul.f32 %v408_v13, %v225_v58 }
 0x1f4   :  { %v412_v17 = vpop.eup %411  ;;  %v266_v18 = vmul.f32 %v410_v15, %v236_v61  ;;  %v276_v19 = vmul.f32 %v332_v12, %v265_v14 }
 0x1f5   :  { %v264_v20 = vmul.f32 %v412_v17, %v228_v0  ;;  %v274_v21 = vmul.f32 %v332_v12, %v263_v16 }
 0x1f6   :  { %v284_v22 = vsel %vm75_vm0, %v276_v19, 0.0  ;;  %v277_v23 = vmul.f32 %v332_v12, %v266_v18 }
 0x1f7   :  { %285 = vadd.xlane.f32.xlu1 %v284_v22  ;;  %v278_v24 = vsel %vm75_vm0, %v274_v21, 0.0  ;;  %v275_v25 = vmul.f32 %v332_v12, %v264_v20 }
 0x1f8   :  { %279 = vadd.xlane.f32.xlu0 %v278_v24  ;;  %v287_v26 = vsel %vm75_vm0, %v277_v23, 0.0 }
 0x1f9   :  { %v281_v27 = vsel %vm75_vm0, %v275_v25, 0.0 }
 0x1fb   :  { %288 = vadd.xlane.f32.xlu1 %v287_v26 }
 0x1fc   :  { %282 = vadd.xlane.f32.xlu0 %v281_v27 }
 0x284   :  { %v286_v29 = vpop.xlane.xlu1 %285 }
 0x285   :  { %v299_v30 = vadd.f32 %v333_v28, %v286_v29  ;;  %v280_v31 = vpop.xlane.xlu0 %279 }
 0x286   :  { %v297_v32 = vadd.f32 %v333_v28, %v280_v31 }
 0x287   :  { %304 = vst.msk [vmem:[%s516_s7 + $0x10] sm:$0xff] %vm301_vm1, %v299_v30 }
 0x288   :  { %302 = vst.msk [vmem:[%s516_s7] sm:$0xff] %vm301_vm1, %v297_v32  ;;  %v289_v33 = vpop.xlane.xlu1 %288 }
 0x289   :  { %v300_v34 = vadd.f32 %v333_v28, %v289_v33  ;;  %v283_v35 = vpop.xlane.xlu0 %282 }
 0x28a   :  { %v298_v36 = vadd.f32 %v333_v28, %v283_v35 }
 0x28b   :  { %305 = vst.msk [vmem:[%s516_s7 + $0x18] sm:$0xff] %vm301_vm1, %v300_v34 }
 0x28c   :  { %303 = vst.msk [vmem:[%s516_s7 + $0x8] sm:$0xff] %vm301_vm1, %v298_v36 }

</bundles_post_ra>
